<compile_context>
chip_gen: v6e
topology: v6e:2x2x1
jax: 0.10.0
libtpu: 0.0.40
codegen_flags: <defaults>
</compile_context>

<pallas_src>
import functools

import jax
import jax.numpy as jnp
import numpy as np
from jax.experimental import pallas as pl
from jax.experimental.pallas import tpu as pltpu

_EPS = 1e-5
_LANES = 128


def _round_up(x, m):
    return (x + m - 1) // m * m


@functools.lru_cache(maxsize=None)
def _vmem_limit_bytes():
    # ~3/4 of physical VMEM: 96 MiB on v5e/v6e (128 MiB), 48 MiB on v7x (64 MiB).
    try:
        cap = int(pltpu.get_tpu_info().vmem_capacity_bytes)
    except Exception:
        cap = 64 * 1024 * 1024          # conservative fallback (safe on all gens)
    return int(min(cap * 3 // 4, 100 * 1024 * 1024))


def _compiler_params():
    return pltpu.CompilerParams(dimension_semantics=("parallel",),
                                vmem_limit_bytes=_vmem_limit_bytes())


def _replicated_spec(shape):
    """Full-array block, same block for every grid step (kept VMEM-resident)."""
    zeros = (0,) * len(shape)
    return pl.BlockSpec(shape, lambda n: zeros)


# ----------------------------------------------------------------------------
# Kernels
# ----------------------------------------------------------------------------
def _conv0_kernel(x_ref, w_ref, h0_ref, stats_ref, *, compute_dtype):
    """Channel-first input tile -> one in-VMEM transpose to the lane-dense
    channel-last layout -> 1x1 conv as one MXU matmul -> partial BN0 stats."""
    x_t = x_ref[0].astype(compute_dtype).T                       # (HW, Cin)
    y = jnp.dot(x_t, w_ref[...], preferred_element_type=jnp.float32)  # (HW, Cm)
    h0_ref[...] = y[None].astype(h0_ref.dtype)
    s = jnp.sum(y, axis=0, keepdims=True)
    sq = jnp.sum(y * y, axis=0, keepdims=True)
    stats_ref[...] = jnp.concatenate([s, sq], axis=0)[None]


def _conv3x3_kernel(h0_ref, w_ref, scale_ref, shift_ref, h1_ref, stats_ref,
                    pad_ref, *, H, W, compute_dtype):
    """BN0 affine + ReLU -> 3x3/pad=1 conv as 9 per-tap MXU matmuls accumulated
    in f32 (no materialized im2col) -> partial BN1 statistics."""
    C = h0_ref.shape[-1]

    # Zero only the 1-px halo.  Done every grid step (not pl.when(id==0)):
    # a "parallel" grid axis may be split across megacore TensorCores, each
    # with its own uninitialized scratch instance.
    zrow = jnp.zeros((1, W + 2, C), pad_ref.dtype)
    zcol = jnp.zeros((H + 2, 1, C), pad_ref.dtype)
    pad_ref[0:1, 0:W + 2, :] = zrow
    pad_ref[H + 1:H + 2, 0:W + 2, :] = zrow
    pad_ref[:, 0:1, :] = zcol
    pad_ref[:, W + 1:W + 2, :] = zcol

    # Fused BN0 affine + ReLU (f32 math), one cast at the interior store.
    a = h0_ref[0].astype(jnp.float32)                             # (HW, C)
    a = jnp.maximum(a * scale_ref[...] + shift_ref[...], 0.0)
    pad_ref[1:H + 1, 1:W + 1, :] = a.reshape(H, W, C).astype(pad_ref.dtype)

    # Per-tap accumulation: 9 matmuls with K=C each, summed in f32.
    # TODO(synk): for large H*W, tile rows inside the kernel (1-row halo per
    # strip) so the per-tap window footprint stays bounded on v7x's 64 MiB VMEM.
    acc = None
    for ky in range(3):
        for kx in range(3):
            win = pad_ref[ky:ky + H, kx:kx + W, :].reshape(H * W, C)
            tap = jnp.dot(win, w_ref[ky * 3 + kx],
                          preferred_element_type=jnp.float32)
            acc = tap if acc is None else acc + tap

    h1_ref[...] = acc[None].astype(h1_ref.dtype)
    s = jnp.sum(acc, axis=0, keepdims=True)
    sq = jnp.sum(acc * acc, axis=0, keepdims=True)
    stats_ref[...] = jnp.concatenate([s, sq], axis=0)[None]


def _conv2_stats_kernel(h1_ref, w_ref, scale_ref, shift_ref, stats_ref, *,
                        compute_dtype):
    """BN1 affine + ReLU -> conv2 matmul, emitting ONLY partial BN2 stats.
    The conv2 activation itself is recomputed in the finalize kernel, so the
    widest intermediate never round-trips HBM."""
    a = jnp.maximum(h1_ref[0].astype(jnp.float32) * scale_ref[...]
                    + shift_ref[...], 0.0)
    y = jnp.dot(a.astype(compute_dtype), w_ref[...],
                preferred_element_type=jnp.float32)
    s = jnp.sum(y, axis=0, keepdims=True)
    sq = jnp.sum(y * y, axis=0, keepdims=True)
    stats_ref[...] = jnp.concatenate([s, sq], axis=0)[None]


def _finalize_kernel(h1_ref, x_ref, w_ref, sc1_ref, sh1_ref, sc2_ref, sh2_ref,
                     out_ref, *, compute_dtype):
    """Recompute conv2 from h1, apply BN2 affine, add the channel-first
    identity residual (read straight from the original f32 input) and the
    final ReLU; store channel-first so the wrapper needs no output transpose."""
    c_out = out_ref.shape[1]
    a = jnp.maximum(h1_ref[0].astype(jnp.float32) * sc1_ref[...]
                    + sh1_ref[...], 0.0)
    y = jnp.dot(a.astype(compute_dtype), w_ref[...],
                preferred_element_type=jnp.float32)               # (HW, Cout_p)
    y = y * sc2_ref[...] + sh2_ref[...]
    y_cf = y.T[:c_out]                                            # (Cout, HW)
    out_ref[...] = jnp.maximum(y_cf + x_ref[0], 0.0)[None].astype(out_ref.dtype)


# ----------------------------------------------------------------------------
# Gridded stages (grid over batch N, "parallel" -> megacore sharding)
# TODO(synk): add a spatial row-tile grid axis / Nb>1 image batching so small-N
# runs keep both v7x TensorCores and the DMA pipeline busy.
# ----------------------------------------------------------------------------
def _conv0_stage(x_cf, w0, *, compute_dtype):
    N, Cin, HW = x_cf.shape
    Cmid_p = w0.shape[1]
    cdb = jnp.dtype(compute_dtype).itemsize
    kern = functools.partial(_conv0_kernel, compute_dtype=compute_dtype)
    flops = 2 * N * HW * Cin * Cmid_p
    bytes_accessed = int(x_cf.size * 4 + w0.size * cdb
                         + N * HW * Cmid_p * cdb + N * 2 * Cmid_p * 4)
    return pl.pallas_call(
        kern,
        grid=(N,),
        in_specs=[pl.BlockSpec((1, Cin, HW), lambda n: (n, 0, 0)),
                  _replicated_spec(w0.shape)],
        out_specs=[pl.BlockSpec((1, HW, Cmid_p), lambda n: (n, 0, 0)),
                   pl.BlockSpec((1, 2, Cmid_p), lambda n: (n, 0, 0))],
        out_shape=[jax.ShapeDtypeStruct((N, HW, Cmid_p), compute_dtype),
                   jax.ShapeDtypeStruct((N, 2, Cmid_p), jnp.float32)],
        compiler_params=_compiler_params(),
        cost_estimate=pl.CostEstimate(flops=flops, transcendentals=0,
                                      bytes_accessed=bytes_accessed),
    )(x_cf, w0)


def _conv3x3_stage(h0, w1, scale, shift, *, H, W, compute_dtype):
    N, HW, C = h0.shape
    Wpad = _round_up(W + 2, 8)       # 8-aligned row stride for the pad scratch
    cdb = jnp.dtype(compute_dtype).itemsize
    kern = functools.partial(_conv3x3_kernel, H=H, W=W,
                             compute_dtype=compute_dtype)
    flops = 2 * N * HW * 9 * C * C
    bytes_accessed = int(h0.size * cdb + w1.size * cdb
                         + N * HW * C * cdb + N * 2 * C * 4)
    return pl.pallas_call(
        kern,
        grid=(N,),
        in_specs=[pl.BlockSpec((1, HW, C), lambda n: (n, 0, 0)),
                  _replicated_spec(w1.shape),
                  _replicated_spec(scale.shape),
                  _replicated_spec(shift.shape)],
        out_specs=[pl.BlockSpec((1, HW, C), lambda n: (n, 0, 0)),
                   pl.BlockSpec((1, 2, C), lambda n: (n, 0, 0))],
        out_shape=[jax.ShapeDtypeStruct((N, HW, C), compute_dtype),
                   jax.ShapeDtypeStruct((N, 2, C), jnp.float32)],
        scratch_shapes=[pltpu.VMEM((H + 2, Wpad, C), compute_dtype)],
        compiler_params=_compiler_params(),
        cost_estimate=pl.CostEstimate(flops=flops, transcendentals=0,
                                      bytes_accessed=bytes_accessed),
    )(h0, w1, scale, shift)


def _conv2_stats_stage(h1, w2, scale, shift, *, compute_dtype):
    N, HW, C = h1.shape
    Cout_p = w2.shape[1]
    cdb = jnp.dtype(compute_dtype).itemsize
    kern = functools.partial(_conv2_stats_kernel, compute_dtype=compute_dtype)
    flops = 2 * N * HW * C * Cout_p
    bytes_accessed = int(h1.size * cdb + w2.size * cdb + N * 2 * Cout_p * 4)
    return pl.pallas_call(
        kern,
        grid=(N,),
        in_specs=[pl.BlockSpec((1, HW, C), lambda n: (n, 0, 0)),
                  _replicated_spec(w2.shape),
                  _replicated_spec(scale.shape),
                  _replicated_spec(shift.shape)],
        out_specs=pl.BlockSpec((1, 2, Cout_p), lambda n: (n, 0, 0)),
        out_shape=jax.ShapeDtypeStruct((N, 2, Cout_p), jnp.float32),
        compiler_params=_compiler_params(),
        cost_estimate=pl.CostEstimate(flops=flops, transcendentals=0,
                                      bytes_accessed=bytes_accessed),
    )(h1, w2, scale, shift)


def _finalize_stage(h1, x_cf, w2, sc1, sh1, sc2, sh2, *, compute_dtype):
    N, HW, C = h1.shape
    Cin = x_cf.shape[1]              # == Cout (guarded in the wrapper)
    cdb = jnp.dtype(compute_dtype).itemsize
    kern = functools.partial(_finalize_kernel, compute_dtype=compute_dtype)
    flops = 2 * N * HW * C * w2.shape[1]
    bytes_accessed = int(h1.size * cdb + x_cf.size * 4 + w2.size * cdb
                         + N * Cin * HW * 4)
    return pl.pallas_call(
        kern,
        grid=(N,),
        in_specs=[pl.BlockSpec((1, HW, C), lambda n: (n, 0, 0)),
                  pl.BlockSpec((1, Cin, HW), lambda n: (n, 0, 0)),
                  _replicated_spec(w2.shape),
                  _replicated_spec(sc1.shape), _replicated_spec(sh1.shape),
                  _replicated_spec(sc2.shape), _replicated_spec(sh2.shape)],
        out_specs=pl.BlockSpec((1, Cin, HW), lambda n: (n, 0, 0)),
        out_shape=jax.ShapeDtypeStruct((N, Cin, HW), jnp.float32),
        compiler_params=_compiler_params(),
        cost_estimate=pl.CostEstimate(flops=flops, transcendentals=0,
                                      bytes_accessed=bytes_accessed),
    )(h1, x_cf, w2, sc1, sh1, sc2, sh2)


def _bn_fold(stats, gamma, beta, count):
    """Reduce per-image (sum, sumsq) partials -> folded BN affine (scale, shift).
    Training-mode BatchNorm: batch mean, biased variance, eps=1e-5."""
    s = jnp.sum(stats[:, 0, :], axis=0)
    sq = jnp.sum(stats[:, 1, :], axis=0)
    mean = s / count
    var = jnp.maximum(sq / count - mean * mean, 0.0)
    # TODO(synk): switch to Welford-style (count, mean, M2) partials at
    # production batch/spatial sizes (single-pass sumsq can cancel in f32).
    scale = gamma * jax.lax.rsqrt(var + _EPS)
    shift = beta - mean * scale
    return scale.reshape(1, -1), shift.reshape(1, -1)


# ----------------------------------------------------------------------------
# Public wrapper: NCHW in / NCHW out (no HBM transpose round trips)
# ----------------------------------------------------------------------------
def bottleneck_block(x_nchw, params, *, stride=1, compute_dtype=jnp.bfloat16):
    w0, w1, w2, g0, b0, g1, b1, g2, b2 = params
    N, Cin, H, W = x_nchw.shape
    Cmid, Cout = w0.shape[1], w2.shape[1]
    if stride != 1 or Cin != Cout:
        # TODO(synk): stride>1 / channel-changing residual needs the PyTorch
        # downsample branch, which is None in this configuration.
        raise ValueError("downsample=None requires stride==1 and Cin==Cout")

    cmid_p = _round_up(Cmid, _LANES)
    cout_p = _round_up(Cout, _LANES)
    HW = H * W

    # Channel-first (N, C, H*W) view of the input: a free bitcast reshape.
    # The switch to the lane-dense channel-last compute layout happens inside
    # conv0 (one small in-VMEM transpose), and the output comes back
    # channel-first from the finalize kernel, so there are no HBM transposes.
    x_cf = x_nchw.reshape(N, Cin, HW).astype(jnp.float32)

    # Weights: zero-pad output channels to the 128-lane boundary (a no-op at
    # real ResNet widths) and cast to the MXU dtype.
    w0_p = jnp.pad(w0, ((0, 0), (0, cmid_p - Cmid))).astype(compute_dtype)
    w1_p = jnp.pad(w1, ((0, 0), (0, cmid_p - Cmid),
                        (0, cmid_p - Cmid))).astype(compute_dtype)
    w2_p = jnp.pad(w2, ((0, cmid_p - Cmid),
                        (0, cout_p - Cout))).astype(compute_dtype)

    def pad_vec(v, cp):
        return jnp.pad(v.reshape(-1).astype(jnp.float32), (0, cp - v.size))

    g0_p, b0_p = pad_vec(g0, cmid_p), pad_vec(b0, cmid_p)
    g1_p, b1_p = pad_vec(g1, cmid_p), pad_vec(b1, cmid_p)
    g2_p, b2_p = pad_vec(g2, cout_p), pad_vec(b2, cout_p)

    count = float(N * HW)             # stride==1 -> Ho*Wo == H*W for all BNs

    # conv0 (1x1) + partial BN0 stats; h0 stored channel-last in compute_dtype.
    h0, st0 = _conv0_stage(x_cf, w0_p, compute_dtype=compute_dtype)
    sc0, sh0 = _bn_fold(st0, g0_p, b0_p, count)

    # BN0 + ReLU + conv1 (3x3, pad=1, per-tap MXU accumulation) + BN1 stats.
    h1, st1 = _conv3x3_stage(h0, w1_p, sc0, sh0, H=H, W=W,
                             compute_dtype=compute_dtype)
    sc1, sh1 = _bn_fold(st1, g1_p, b1_p, count)

    # BN1 + ReLU + conv2 (1x1): stats only (conv2 activation never hits HBM).
    st2 = _conv2_stats_stage(h1, w2_p, sc1, sh1, compute_dtype=compute_dtype)
    sc2, sh2 = _bn_fold(st2, g2_p, b2_p, count)

    # Recompute conv2, BN2 affine + identity residual + final ReLU.
    out_cf = _finalize_stage(h1, x_cf, w2_p, sc1, sh1, sc2, sh2,
                             compute_dtype=compute_dtype)
    return out_cf.reshape(N, Cout, H, W)          # free bitcast reshape


# ----------------------------------------------------------------------------
# Pure-JAX reference of the PyTorch forward (training-mode BN)
# ----------------------------------------------------------------------------
def reference(x_nchw, params):
    w0, w1, w2, g0, b0, g1, b1, g2, b2 = params
    x = jnp.transpose(x_nchw, (0, 2, 3, 1)).astype(jnp.float32)
    Cmid = w0.shape[1]

    def conv(h, w, s, p):
        return jax.lax.conv_general_dilated(
            h, w, (s, s), [(p, p), (p, p)],
            dimension_numbers=("NHWC", "HWIO", "NHWC"))

    def bn(h, g, b):
        mean = jnp.mean(h, axis=(0, 1, 2), keepdims=True)
        var = jnp.mean((h - mean) ** 2, axis=(0, 1, 2), keepdims=True)
        return ((h - mean) / jnp.sqrt(var + _EPS)) * g.reshape(1, 1, 1, -1) \
               + b.reshape(1, 1, 1, -1)

    h = jax.nn.relu(bn(conv(x, w0.reshape(1, 1, -1, Cmid), 1, 0), g0, b0))
    h = jax.nn.relu(bn(conv(h, w1.reshape(3, 3, Cmid, Cmid), 1, 1), g1, b1))
    h = bn(conv(h, w2.reshape(1, 1, Cmid, -1), 1, 0), g2, b2)
    out = jax.nn.relu(h + x)
    return jnp.transpose(out, (0, 3, 1, 2))


if __name__ == "__main__":
    # downsample=None  =>  stride=1 and in_channels == out_channels*expansion.
    N, H, W = 2, 16, 16
    out_channels, expansion, stride = 16, 4, 1
    Cin = out_channels * expansion      # 64
    Cmid = out_channels                 # 16
    Cout = out_channels * expansion     # 64

    key = jax.random.PRNGKey(0)
    ks = jax.random.split(key, 10)
    x = jax.random.normal(ks[0], (N, Cin, H, W), jnp.float32)
    # Synthetic parameters (conv weights stored channels-last / tap-major).
    w0 = 0.2 * jax.random.normal(ks[1], (Cin, Cmid), jnp.float32)       # 1x1
    w1 = 0.2 * jax.random.normal(ks[2], (9, Cmid, Cmid), jnp.float32)   # 3x3 [ky*3+kx, cin, cout]
    w2 = 0.2 * jax.random.normal(ks[3], (Cmid, Cout), jnp.float32)      # 1x1
    g0 = 1.0 + 0.1 * jax.random.normal(ks[4], (Cmid,), jnp.float32)
    b0 = 0.1 * jax.random.normal(ks[5], (Cmid,), jnp.float32)
    g1 = 1.0 + 0.1 * jax.random.normal(ks[6], (Cmid,), jnp.float32)
    b1 = 0.1 * jax.random.normal(ks[7], (Cmid,), jnp.float32)
    g2 = 1.0 + 0.1 * jax.random.normal(ks[8], (Cout,), jnp.float32)
    b2 = 0.1 * jax.random.normal(ks[9], (Cout,), jnp.float32)
    params = (w0, w1, w2, g0, b0, g1, b1, g2, b2)

    ref = jax.block_until_ready(reference(x, params))

    # bf16 operands + bf16 intermediates (f32 accumulation / BN): fast path.
    out_bf16 = jax.block_until_ready(
        bottleneck_block(x, params, stride=stride, compute_dtype=jnp.bfloat16))
    assert out_bf16.shape == (N, Cout, H, W), out_bf16.shape
    np.testing.assert_allclose(np.asarray(out_bf16), np.asarray(ref),
                               rtol=4e-2, atol=4e-2)

    # f32 operands + f32 intermediates: tight check against the module math.
    out_f32 = jax.block_until_ready(
        bottleneck_block(x, params, stride=stride, compute_dtype=jnp.float32))
    np.testing.assert_allclose(np.asarray(out_f32), np.asarray(ref),
                               rtol=2e-3, atol=2e-3)

    print("KERNEL_OK")
</pallas_src>

<mosaic_0001>
module attributes {stable_mosaic.version = 11 : i64} {
  func.func @_conv0_kernel(%arg0: i32, %arg1: memref<1x64x256xf32, #tpu.memory_space<vmem>>, %arg2: memref<64x128xbf16, #tpu.memory_space<vmem>>, %arg3: memref<1x256x128xbf16, #tpu.memory_space<vmem>>, %arg4: memref<1x2x128xf32, #tpu.memory_space<vmem>>) attributes {dimension_semantics = [#tpu.dimension_semantics<parallel>], iteration_bounds = array<i64: 2>, scalar_prefetch = 0 : i64, scratch_operands = 0 : i64, tpu.core_type = #tpu.core_type<tc>, window_params = [{transform_indices = @transform_0, window_bounds = array<i64: 1, 64, 256>}, {pipeline_mode = #tpu.pipeline_mode<synchronous>, transform_indices = @transform_1, window_bounds = array<i64: 64, 128>}, {transform_indices = @transform_2, window_bounds = array<i64: 1, 256, 128>}, {transform_indices = @transform_3, window_bounds = array<i64: 1, 2, 128>}]} {
    %c0 = arith.constant 0 : index
    %c0_0 = arith.constant 0 : index
    %c0_1 = arith.constant 0 : index
    %0 = vector.load %arg1[%c0, %c0_0, %c0_1] : memref<1x64x256xf32, #tpu.memory_space<vmem>>, vector<1x64x256xf32>
    %1 = vector.shape_cast %0 : vector<1x64x256xf32> to vector<64x256xf32>
    %2 = arith.truncf %1 : vector<64x256xf32> to vector<64x256xbf16>
    %3 = tpu.transpose %2, [1, 0] : vector<64x256xbf16> -> vector<256x64xbf16>
    %c0_2 = arith.constant 0 : index
    %c0_3 = arith.constant 0 : index
    %4 = vector.load %arg2[%c0_2, %c0_3] : memref<64x128xbf16, #tpu.memory_space<vmem>>, vector<64x128xbf16>
    %cst = arith.constant dense<0.000000e+00> : vector<256x128xf32>
    %5 = tpu.matmul %3, %4, %cst {dimension_numbers = #tpu.dot_dimension_numbers<[1], [0], [0], [1], [0, 0, 1, 1], [], []>} : vector<256x64xbf16>, vector<64x128xbf16>, vector<256x128xf32> -> vector<256x128xf32>
    %6 = vector.shape_cast %5 : vector<256x128xf32> to vector<1x256x128xf32>
    %7 = arith.truncf %6 : vector<1x256x128xf32> to vector<1x256x128xbf16>
    %c0_4 = arith.constant 0 : index
    %c0_5 = arith.constant 0 : index
    %c0_6 = arith.constant 0 : index
    %8 = vector.load %arg3[%c0_4, %c0_5, %c0_6] : memref<1x256x128xbf16, #tpu.memory_space<vmem>>, vector<1x256x128xbf16>
    tpu.vector_store %arg3[%c0_4, %c0_5, %c0_6], %7 {strides = array<i32>} : memref<1x256x128xbf16, #tpu.memory_space<vmem>>, vector<1x256x128xbf16>,
    %cst_7 = arith.constant dense<0.000000e+00> : vector<128xf32>
    %9 = vector.multi_reduction <add>, %5, %cst_7 [0] : vector<256x128xf32> to vector<128xf32>
    %10 = vector.shape_cast %9 : vector<128xf32> to vector<1x128xf32>
    %11 = arith.mulf %5, %5 : vector<256x128xf32>
    %cst_8 = arith.constant dense<0.000000e+00> : vector<128xf32>
    %12 = vector.multi_reduction <add>, %11, %cst_8 [0] : vector<256x128xf32> to vector<128xf32>
    %13 = vector.shape_cast %12 : vector<128xf32> to vector<1x128xf32>
    %14 = tpu.concatenate %10, %13 in 0 : vector<1x128xf32>, vector<1x128xf32> -> vector<2x128xf32>
    %15 = vector.shape_cast %14 : vector<2x128xf32> to vector<1x2x128xf32>
    %c0_9 = arith.constant 0 : index
    %c0_10 = arith.constant 0 : index
    %c0_11 = arith.constant 0 : index
    %16 = vector.load %arg4[%c0_9, %c0_10, %c0_11] : memref<1x2x128xf32, #tpu.memory_space<vmem>>, vector<1x2x128xf32>
    tpu.vector_store %arg4[%c0_9, %c0_10, %c0_11], %15 {strides = array<i32>} : memref<1x2x128xf32, #tpu.memory_space<vmem>>, vector<1x2x128xf32>,
    return
  }
  func.func @transform_0(%arg0: i32) -> (i32, i32, i32) {
    %c0_i32 = arith.constant 0 : i32
    %c0_i32_0 = arith.constant 0 : i32
    %c0_i32_1 = arith.constant 0 : i32
    return %arg0, %c0_i32, %c0_i32_0 : i32, i32, i32
  }
  func.func @transform_1(%arg0: i32) -> (i32, i32) {
    %c0_i32 = arith.constant 0 : i32
    %c0_i32_0 = arith.constant 0 : i32
    %c0_i32_1 = arith.constant 0 : i32
    return %c0_i32, %c0_i32_0 : i32, i32
  }
  func.func @transform_2(%arg0: i32) -> (i32, i32, i32) {
    %c0_i32 = arith.constant 0 : i32
    %c0_i32_0 = arith.constant 0 : i32
    %c0_i32_1 = arith.constant 0 : i32
    return %arg0, %c0_i32, %c0_i32_0 : i32, i32, i32
  }
  func.func @transform_3(%arg0: i32) -> (i32, i32, i32) {
    %c0_i32 = arith.constant 0 : i32
    %c0_i32_0 = arith.constant 0 : i32
    %c0_i32_1 = arith.constant 0 : i32
    return %arg0, %c0_i32, %c0_i32_0 : i32, i32, i32
  }
}

</mosaic_0001>

<bundles_post_ra>
// kernel: tpu_custom_call.1
= control target key start
LH: loop header
LB: loop body
LE: loop exit
PB: predicated region body
PF: predicated region fallthrough
CT: control target
= control target key end

     0   :  { %9 = vsyncpa [#allocation3], 0  ;;  %s1809_s0 = inlined_call_operand.hbm [shape: f32[2,64,256], index: 0, kind: input, shape index: {}]   ;;  %s1810_s1 = inlined_call_operand.hbm [shape: bf16[64,128], index: 1, kind: input, shape index: {}]   ;;  %s1811_s2 = inlined_call_operand.hbm [shape: bf16[2,256,128], index: 2, kind: output, shape index: {0}]   ;;  %s1812_s3 = inlined_call_operand.hbm [shape: f32[2,2,128], index: 3, kind: output, shape index: {1}]  }
   0x1   :  { %11 = vsyncpa [#allocation3 + $0x1], 0 }
   0x2   :  { %12 = vsyncpa [#allocation6], 0 }
   0x3   :  { %13 = vsyncpa [#allocation4], 0 }
   0x4   :  { %15 = vsyncpa [#allocation4 + $0x1], 0 }
   0x5   :  { %16 = vsyncpa [#allocation9], 0 }
   0x6   :  { %18 = vsyncpa [#allocation9 + $0x1], 0  ;;  %s1455_s12 = smov 0   ;;  %s1457_s13 = smov 0  }
   0x7   :  { %s1459_s14 = smov 0   ;;  %s1461_s15 = smov 0  }
   0x8 LB: > { %s1476_s16 = sadd.s32 4294967295, %s1423_s15   ;;  %s930_s17 = sadd.s32 4294967294, %s1423_s15   ;;  %s1423_s15 = sphi %s1461_s15, %s1834_s15   ;;  %s1419_s14 = sphi %s1459_s14, %s1833_s14   ;;  %s1415_s13 = sphi %s1457_s13, %s1832_s13   ;;  %s1411_s12 = sphi %s1455_s12, %s1831_s12  }
   0x9   : > { %p44_p0 = scmp.ne.s32.totalorder %s1415_s13, %s1411_s12  ;;  %p1813_p1 = scmp.eq.s32.totalorder %s1476_s16, 0 }
   0xa   : > { %p95_p3 = scmp.eq.s32.totalorder %s930_s17, 1  ;;  %p931_p5 = scmp.ge.s32.totalorder %s1423_s15, 1 }
   0xb   : > { %p1485_p4 = por %p1813_p1, %p44_p0  ;;  %p128_p7 = scmp.lt.s32.totalorder %s1423_s15, 3 }
   0xc   : > { %p1490_p6 = por %p95_p3, %p44_p0  ;;  %s1425_s21 = smov [#allocation5]  }
   0xd   : > { %s1817_s18 = scalar_select %p1485_p4, 1, 0 }
   0xe   : > { %s1818_s19 = scalar_select %p1490_p6, 1, 0 }
   0xf   : > { %p1495_p8 = pnand %p931_p5, %p128_p7  ;;  %s140_s22 = sshll.u32 %s1425_s21, 4  ;;  %s141_s22 = int_to_ptr.vmem [resolvable:$true] %s140_s22 }
  0x10   : > { %s1509_s24 = sadd.s32 1, %s1423_s15   ;;  %s31_s25 = sadd.s32 1, %s1419_s14 }
  0x11   : > { %s1819_s20 = scalar_select %p1495_p8, 1, 0 }
  0x12   : > { %p1208_p9 = pneg %p1495_p8  ;;  %s28_s26 = ssub.s32 %s1423_s15, %s1509_s24 }
  0x13   : > { %s1282_s27 = scalar_lea.vmem %s141_s22, 512  ;;  %p1290_p5 = scmp.lt.s32.totalorder %s141_s22, %s141_s22 }
  0x14   : > { %p1504_p11 = pnand %p1208_p9, %p1813_p1  ;;  %p1283_p13 = scmp.ne.s32.totalorder %s141_s22, %s1282_s27 }
  0x15   : > { %p1291_p7 = scmp.lt.s32.totalorder %s1282_s27, %s1282_s27 }
  0x16   : > { %p1273_p12 = pneg %p1504_p11 }
  0x17   : > { %p1292_p10 = por %p1291_p7, %p1290_p5 }
  0x18   : > { %p1285_p0 = pnand %p1283_p13, %p1273_p12 }
  0x1a   : > { %p1286_p3 = pneg %p1285_p0 }
  0x1c   : > { %p1293_p2 = pnand %p1292_p10, %p1286_p3 }
  0x1e   : > { %1296 = shalt.err (!%p1293_p2)
}
  0x1f   : > { %s1426_s28 = smov 64   ;;  %s1427_s29 = smov 4  }
  0x20   : > { %1211 = dma.hbm_to_vmem [thread:$0]  (!%p1504_p11), %s1810_s1, 512, %s141_s22, [#allocation6], %s1426_s28, %s1426_s28, %s1427_s29  }
  0x21   : > { %p29_p9 = scmp.eq.s32.totalorder %s28_s26, 0  ;;  %p38_p12 = scmp.ne.s32.totalorder %s1419_s14, %s1415_s13 }
  0x22   : > { %p39_p10 = scmp.eq.s32.totalorder %s1423_s15, 0  ;;  %p1224_p2 = scmp.lt.s32.totalorder %s1423_s15, 2 }
  0x23   : > { %s1526_s5 = scalar_select %p29_p9, %s1419_s14, %s31_s25  }
  0x24   : > { %p40_p13 = por %p39_p10, %p38_p12  ;;  %p1821_p0 = scmp.eq.s32.totalorder %s1476_s16, 1 }
  0x25   : > { %s154_s7 = sand.u32 1, %s1419_s14   ;;  %s1001_s8 = sshll.u32 %s1423_s15, 11 }
  0x26   : > { %p1530_p3 = por %p1821_p0, %p38_p12  ;;  %s934_s9 = sshll.u32 %s154_s7, 7 }
  0x27   : > { %s1539_s17 = scalar_lea.hbm %s1809_s0, %s1001_s8  ;;  %s158_s21 = scalar_lea.vmem [#allocation2], %s934_s9 }
  0x28   : > { %s1822_s6 = scalar_select %p1530_p3, 1, 0 }
  0x29   : > { %s165_s22 = sshll.u32 %s158_s21, 4  ;;  %p1541_p11 = pnand %p1224_p2, %p40_p13  ;;  %s1545_s22 = int_to_ptr.vmem [resolvable:$true] %s165_s22 }
  0x2a   : > { %s1547_s25 = scalar_lea.sflag [#allocation3], %s154_s7  ;;  %s1297_s26 = scalar_lea.hbm %s1539_s17, 2048 }
  0x2b   : > { %p1298_p5 = scmp.ne.s32.totalorder %s1539_s17, %s1297_s26  ;;  %p1299_p7 = pneg %p1541_p11 }
  0x2c   : > { %s1302_s29 = scalar_lea.hbm %s1809_s0, 4096  ;;  %p1303_p10 = scmp.lt.s32.totalorder %s1539_s17, %s1809_s0 }
  0x2d   : > { %p1300_p9 = pnand %p1299_p7, %p1298_p5  ;;  %p1304_p2 = scmp.lt.s32.totalorder %s1302_s29, %s1297_s26 }
  0x2f   : > { %p1301_p12 = pneg %p1300_p9  ;;  %p1305_p13 = por %p1304_p2, %p1303_p10 }
  0x31   : > { %p1306_p0 = pnand %p1305_p13, %p1301_p12 }
  0x33   : > { %1309 = shalt.err (!%p1306_p0)
}
  0x34   : > { %s1310_s7 = scalar_lea.vmem %s1545_s22, 2048  ;;  %s1428_s8 = smov [#allocation2]  }
  0x35   : > { %p1311_p1 = scmp.ne.s32.totalorder %s1545_s22, %s1310_s7  ;;  %s1315_s9 = sshll.u32 %s1428_s8, 4  ;;  %s1316_s9 = int_to_ptr.vmem [resolvable:$false] %s1315_s9 }
  0x36   : > { %s1317_s10 = scalar_lea.vmem %s1316_s9, 4096  ;;  %p1318_p9 = scmp.lt.s32.totalorder %s1545_s22, %s1316_s9 }
  0x37   : > { %p1313_p6 = pnand %p1311_p1, %p1299_p7  ;;  %p1319_p3 = scmp.lt.s32.totalorder %s1317_s10, %s1310_s7 }
  0x39   : > { %p1314_p5 = pneg %p1313_p6  ;;  %p1320_p4 = por %p1319_p3, %p1318_p9 }
  0x3b   : > { %p1321_p8 = pnand %p1320_p4, %p1314_p5 }
  0x3d   : > { %1324 = shalt.err (!%p1321_p8)
}
  0x3e   : > { %s1429_s11 = smov 256   ;;  %s1430_s21 = smov 16  }
  0x3f   : > { %1215 = dma.hbm_to_vmem [thread:$0]  (!%p1541_p11), %s1539_s17, 2048, %s1545_s22, %s1547_s25, %s1429_s11, %s1429_s11, %s1430_s21  }
  0x40   : > { %p1824_p1 = scmp.ne.s32.totalorder %s1819_s20, 0 }
  0x41   : > { %s1571_s26 = sand.u32 (!%p1824_p1), 1, %s1415_s13   ;;  %p1825_p4 = scmp.ne.s32.totalorder (!%p1824_p1), %s1817_s18, 0 }
  0x42   : > { %177 = sbr.rel (%p1824_p1) target bundleno = 480 (0x1e0), region = 28  ;;  %s938_s27 = sshll.u32 (!%p1824_p1), %s1571_s26, 7 }
  0x43   : > { %s180_s28 = scalar_lea.sflag (!%p1824_p1), [#allocation3], %s1571_s26  ;;  %s1577_s29 = scalar_lea.vmem (!%p1824_p1), [#allocation2], %s938_s27 }
  0x47   : > { %1394 = dma.done.wait (%p1825_p4), %s180_s28, 2048  }
  0x48   : > { %1396 = vsyncadd (%p1825_p4), %s180_s28, 4294965248  ;;  %p1826_p6 = scmp.eq.s32.totalorder %s1476_s16, 0 }
  0x4a   : > { %1398 = dma.done.wait (%p1826_p6), [#allocation6], 512   ;;  %p1827_p8 = pmov %p1826_p6 }
  0x4b   : > { %v216_v0 = vld [vmem:[%s1577_s29] sm:$0xff]  ;;  %v218_v1 = vld [vmem:[%s1577_s29 + $0x10] sm:$0xff]  ;;  %v217_v5 = vld [vmem:[%s1577_s29 + $0x8] sm:$0xff]  ;;  %vm304_vm0 = vcmask 523264   ;;  %s1625_s18 = scalar_lea.vmem [#allocation7], %s938_s27  ;;  %s1034_s20 = sshll.u32 %s1476_s16, 11 }
  0x4c   : > { %1400 = vsyncadd (%p1827_p8), [#allocation6], 4294966784  ;;  %v220_v2 = vld [vmem:[%s1577_s29 + $0x20] sm:$0xff]  ;;  %v232_v3 = vpack.c.bf16 %v218_v1, %v216_v0  ;;  %v222_v4 = vld [vmem:[%s1577_s29 + $0x30] sm:$0xff]  ;;  %s802_s17 = sshll.u32 %s1625_s18, 4  ;;  %s1688_s25 = scalar_lea.hbm %s1811_s2, %s1034_s20  ;;  %s1690_s17 = int_to_ptr.vmem [resolvable:$true] %s802_s17 }
  0x4d   : > { %v234_v6 = vpack.c.bf16 %v222_v4, %v220_v2  ;;  %v219_v7 = vld [vmem:[%s1577_s29 + $0x18] sm:$0xff]  ;;  %v221_v8 = vld [vmem:[%s1577_s29 + $0x28] sm:$0xff]  ;;  %v224_v10 = vld [vmem:[%s1577_s29 + $0x40] sm:$0xff]  ;;  %s784_s30 = scalar_lea.sflag [#allocation4], %s1571_s26  ;;  %s1325_s4 = scalar_lea.vmem %s1690_s17, 2048 }
  0x4e   : > { %240 = vxpose.xlu0.c.b16.start [1/4] (short) %v232_v3, 128  ;;  %v223_v9 = vld [vmem:[%s1577_s29 + $0x38] sm:$0xff]  ;;  %v226_v11 = vld [vmem:[%s1577_s29 + $0x50] sm:$0xff]  ;;  %v233_v12 = vpack.c.bf16 %v219_v7, %v217_v5  ;;  %v225_v13 = vld [vmem:[%s1577_s29 + $0x48] sm:$0xff]  ;;  %p1326_p3 = scmp.ne.s32.totalorder %s1690_s17, %s1325_s4  ;;  %p1828_p11 = scmp.ne.s32.totalorder %s1822_s6, 0 }
  0x4f   : > { %v227_v14 = vld [vmem:[%s1577_s29 + $0x58] sm:$0xff]  ;;  %v228_v15 = vld [vmem:[%s1577_s29 + $0x60] sm:$0xff]  ;;  %v235_v16 = vpack.c.bf16 %v223_v9, %v221_v8  ;;  %v236_v18 = vpack.c.bf16 %v226_v11, %v224_v10  ;;  %v1268_v19 = vld [vmem:[#allocation5 + $0x10] sm:$0xff]   ;;  %s1431_s7 = smov [#allocation7]  }
  0x50   : > { %256 = vxpose.xlu1.c.b16.start [1/4] (short) %v233_v12, 128  ;;  %v1267_v17 = vld [vmem:[#allocation5 + $0x18] sm:$0xff]   ;;  %v230_v20 = vld [vmem:[%s1577_s29 + $0x70] sm:$0xff]  ;;  %v237_v21 = vpack.c.bf16 %v227_v14, %v225_v13  ;;  %v1269_v22 = vld [vmem:[#allocation5 + $0x8] sm:$0xff]   ;;  %p1327_p7 = pnand %p1326_p3, %p1828_p11  ;;  %s1329_s8 = sshll.u32 %s1431_s7, 4  ;;  %s1330_s8 = int_to_ptr.vmem [resolvable:$false] %s1329_s8 }
  0x51   : > { %1150 = vmatprep.subr.bf16.mxu0 %v1267_v17  ;;  %1190 = vmatprep.subr.bf16.mxu1 %v1267_v17  ;;  %v238_v23 = vpack.c.bf16 %v230_v20, %v228_v15  ;;  %v229_v24 = vld [vmem:[%s1577_s29 + $0x68] sm:$0xff]  ;;  %v231_v25 = vld [vmem:[%s1577_s29 + $0x78] sm:$0xff]  ;;  %v1270_v27 = vld [vmem:[#allocation5] sm:$0xff]   ;;  %s1331_s9 = scalar_lea.vmem %s1330_s8, 4096  ;;  %p1332_p10 = scmp.lt.s32.totalorder %s1690_s17, %s1330_s8 }
  0x52   : > { %241 = vxpose.xlu0.c.b16.cont [2/4] (short) %v234_v6, 128  ;;  %1151 = vmatpush3.bf16.msra.mxu0 %v1267_v17  ;;  %v239_v26 = vpack.c.bf16 %v231_v25, %v229_v24  ;;  %p1328_p12 = pneg %p1327_p7  ;;  %p1333_p2 = scmp.lt.s32.totalorder %s1331_s9, %s1325_s4 }
  0x53   : > { %1194 = vmatpush3.bf16.msra.mxu1 %v1267_v17  ;;  %1152 = vmatprep.subr.bf16.mxu0 %v1268_v19 }
  0x54   : > { %257 = vxpose.xlu1.c.b16.cont [2/4] (short) %v235_v16, 128  ;;  %1191 = vmatprep.subr.bf16.mxu1 %v1268_v19  ;;  %p1334_p13 = por %p1333_p2, %p1332_p10 }
  0x56   : > { %242 = vxpose.xlu0.c.b16.cont [3/4] (short) %v236_v18, 128  ;;  %1153 = vmatpush3.bf16.msra.mxu0 %v1268_v19  ;;  %p1335_p0 = pnand %p1334_p13, %p1328_p12 }
  0x57   : > { %1195 = vmatpush3.bf16.msra.mxu1 %v1268_v19  ;;  %1154 = vmatprep.subr.bf16.mxu0 %v1269_v22 }
  0x58   : > { %258 = vxpose.xlu1.c.b16.cont [3/4] (short) %v237_v21, 128  ;;  %1192 = vmatprep.subr.bf16.mxu1 %v1269_v22 }
  0x5a   : > { %243 = vxpose.xlu0.c.b16.end [4/4] (short) %v238_v23, 128  ;;  %1155 = vmatpush3.bf16.msra.mxu0 %v1269_v22 }
  0x5b   : > { %1196 = vmatpush3.bf16.msra.mxu1 %v1269_v22  ;;  %1156 = vmatprep.subr.bf16.mxu0 %v1270_v27 }
  0x5c   : > { %259 = vxpose.xlu1.c.b16.end [4/4] (short) %v239_v26, 128  ;;  %1193 = vmatprep.subr.bf16.mxu1 %v1270_v27 }
  0x5e   : > { %1157 = vmatpush3.bf16.msra.mxu0 %v1270_v27 }
  0x5f   : > { %1197 = vmatpush3.bf16.msra.mxu1 %v1270_v27 }
  0xb0   : > { %v248_v28 = vpop.trf.xlu0 }
  0xb1   : > { %1158 = vmatprep.mubr.msk.bf16.mxu0 %vm304_vm0, %v248_v28 }
  0xb2   : > { %v264_v29 = vpop.trf.xlu1 }
  0xb3   : > { %1174 = vmatprep.mubr.msk.bf16.mxu1 %vm304_vm0, %v264_v29 }
  0xb4   : > { %v249_v30 = vpop.trf.xlu0 }
  0xb5   : > { %1159 = vmatmul.mubr.msk.bf16.vlgmr.msra.gmra.mxu0 %vm304_vm0, %v249_v30 }
  0xb6   : > { %v265_v31 = vpop.trf.xlu1 }
  0xb7   : > { %1175 = vmatmul.mubr.msk.bf16.vlgmr.msra.gmra.mxu1 %vm304_vm0, %v265_v31 }
  0xb8   : > { %v250_v32 = vpop.trf.xlu0 }
  0xb9   : > { %1162 = vmatprep.mubr.msk.bf16.mxu0 %vm304_vm0, %v250_v32 }
  0xba   : > { %v266_v33 = vpop.trf.xlu1 }
  0xbb   : > { %1178 = vmatprep.mubr.msk.bf16.mxu1 %vm304_vm0, %v266_v33 }
  0xbc   : > { %v251_v34 = vpop.trf.xlu0 }
  0xbd   : > { %1163 = vmatmul.mubr.msk.bf16.gmra.mxu0 %vm304_vm0, %v251_v34 }
  0xbe   : > { %v267_v35 = vpop.trf.xlu1 }
  0xbf   : > { %1179 = vmatmul.mubr.msk.bf16.gmra.mxu1 %vm304_vm0, %v267_v35 }
  0xc0   : > { %v252_v36 = vpop.trf.xlu0 }
  0xc1   : > { %1166 = vmatprep.mubr.msk.bf16.mxu0 %vm304_vm0, %v252_v36 }
  0xc2   : > { %v268_v37 = vpop.trf.xlu1 }
  0xc3   : > { %1182 = vmatprep.mubr.msk.bf16.mxu1 %vm304_vm0, %v268_v37 }
  0xc4   : > { %v253_v38 = vpop.trf.xlu0 }
  0xc5   : > { %1167 = vmatmul.mubr.msk.bf16.gmra.mxu0 %vm304_vm0, %v253_v38 }
  0xc6   : > { %v269_v39 = vpop.trf.xlu1 }
  0xc7   : > { %1183 = vmatmul.mubr.msk.bf16.gmra.mxu1 %vm304_vm0, %v269_v39 }
  0xc8   : > { %v254_v40 = vpop.trf.xlu0 }
  0xc9   : > { %1170 = vmatprep.mubr.msk.bf16.mxu0 %vm304_vm0, %v254_v40 }
  0xca   : > { %v270_v41 = vpop.trf.xlu1 }
  0xcb   : > { %1186 = vmatprep.mubr.msk.bf16.mxu1 %vm304_vm0, %v270_v41 }
  0xcc   : > { %v255_v42 = vpop.trf.xlu0 }
  0xcd   : > { %1171 = vmatmul.mubr.msk.bf16.gmra.mxu0 %vm304_vm0, %v255_v42 }
  0xce   : > { %v271_v43 = vpop.trf.xlu1 }
  0xcf   : > { %1187 = vmatmul.mubr.msk.bf16.gmra.mxu1 %vm304_vm0, %v271_v43 }
 0x175   : > { %v1160_v44 = vpop.f32.mrf.mxu0 }
 0x176   : > { %v713_v58 = vmul.f32 %v1160_v44, %v1160_v44 }
 0x177   : > { %v387_v45 = vpop.f32.mrf.mxu0  ;;  %v1619_v46 = vpop.f32.mrf.mxu1 }
 0x178   : > { %v711_v51 = vmul.f32 %v387_v45, %v387_v45 }
 0x179   : > { %v1161_v47 = vpop.f32.mrf.mxu0  ;;  %v1621_v49 = vpop.f32.mrf.mxu1 }
 0x17a   : > { %v1043_v48 = vpack.c.bf16 %v1161_v47, %v1160_v44  ;;  %v714_v0 = vmul.f32 %v1161_v47, %v1161_v47 }
 0x17b   : > { %v390_v50 = vpop.f32.mrf.mxu0  ;;  %v1628_v55 = vpop.f32.mrf.mxu1 }
 0x17c   : > { %1115 = vst [vmem:[%s1625_s18 + $0x8] sm:$0xff] %v1043_v48   ;;  %v1038_v52 = vpack.c.bf16 %v390_v50, %v387_v45  ;;  %v674_v53 = vadd.f32 %v390_v50, %v387_v45  ;;  %v712_v54 = vmul.f32 %v390_v50, %v390_v50  ;;  %v1083_v57 = vpack.c.bf16 %v1628_v55, %v1619_v46 }
 0x17d   : > { %v1164_v56 = vpop.f32.mrf.mxu0  ;;  %v1633_v61 = vpop.f32.mrf.mxu1 }
 0x17e   : > { %1039 = vst [vmem:[%s1625_s18] sm:$0xff] %v1038_v52   ;;  %v675_v59 = vadd.f32 %v1160_v44, %v674_v53  ;;  %v743_v60 = vadd.f32 %v712_v54, %v711_v51  ;;  %1123 = vst [vmem:[%s1625_s18 + $0x48] sm:$0xff] %v1083_v57   ;;  %v1078_v63 = vpack.c.bf16 %v1633_v61, %v1621_v49 }
 0x17f   : > { %v403_v62 = vpop.f32.mrf.mxu0  ;;  %v1638_v3 = vpop.f32.mrf.mxu1  ;;  %v717_v18 = vmul.f32 %v1164_v56, %v1164_v56 }
 0x180   : > { %v744_v1 = vadd.f32 %v743_v60, %v713_v58  ;;  %v676_v2 = vadd.f32 %v1161_v47, %v675_v59  ;;  %1122 = vst [vmem:[%s1625_s18 + $0x40] sm:$0xff] %v1078_v63   ;;  %v715_v6 = vmul.f32 %v403_v62, %v403_v62 }
 0x181   : > { %v1165_v4 = vpop.f32.mrf.mxu0  ;;  %v1641_v9 = vpop.f32.mrf.mxu1 }
 0x182   : > { %v677_v5 = vadd.f32 %v676_v2, %v403_v62  ;;  %v745_v7 = vadd.f32 %v744_v1, %v714_v0  ;;  %v1053_v8 = vpack.c.bf16 %v1165_v4, %v1164_v56  ;;  %v718_v24 = vmul.f32 %v1165_v4, %v1165_v4 }
 0x183   : > { %v406_v10 = vpop.f32.mrf.mxu0  ;;  %v1644_v15 = vpop.f32.mrf.mxu1 }
 0x184   : > { %v746_v11 = vadd.f32 %v745_v7, %v715_v6  ;;  %1117 = vst [vmem:[%s1625_s18 + $0x18] sm:$0xff] %v1053_v8   ;;  %v1048_v12 = vpack.c.bf16 %v406_v10, %v403_v62  ;;  %v678_v13 = vadd.f32 %v677_v5, %v406_v10  ;;  %v716_v14 = vmul.f32 %v406_v10, %v406_v10 }
 0x185   : > { %v1168_v16 = vpop.f32.mrf.mxu0  ;;  %v1093_v17 = vpack.c.bf16 %v1644_v15, %v1638_v3  ;;  %v1649_v21 = vpop.f32.mrf.mxu1 }
 0x186   : > { %1116 = vst [vmem:[%s1625_s18 + $0x10] sm:$0xff] %v1048_v12   ;;  %v679_v19 = vadd.f32 %v1164_v56, %v678_v13  ;;  %v747_v20 = vadd.f32 %v746_v11, %v716_v14  ;;  %v1088_v23 = vpack.c.bf16 %v1649_v21, %v1641_v9  ;;  %v721_v42 = vmul.f32 %v1168_v16, %v1168_v16 }
 0x187   : > { %v419_v22 = vpop.f32.mrf.mxu0  ;;  %1125 = vst [vmem:[%s1625_s18 + $0x58] sm:$0xff] %v1093_v17   ;;  %v1654_v27 = vpop.f32.mrf.mxu1 }
 0x188   : > { %v748_v25 = vadd.f32 %v747_v20, %v717_v18  ;;  %v680_v26 = vadd.f32 %v1165_v4, %v679_v19  ;;  %1124 = vst [vmem:[%s1625_s18 + $0x50] sm:$0xff] %v1088_v23   ;;  %v719_v30 = vmul.f32 %v419_v22, %v419_v22 }
 0x189   : > { %v1169_v28 = vpop.f32.mrf.mxu0  ;;  %v1657_v33 = vpop.f32.mrf.mxu1 }
 0x18a   : > { %v681_v29 = vadd.f32 %v680_v26, %v419_v22  ;;  %v749_v31 = vadd.f32 %v748_v25, %v718_v24  ;;  %v1063_v32 = vpack.c.bf16 %v1169_v28, %v1168_v16  ;;  %v722_v50 = vmul.f32 %v1169_v28, %v1169_v28 }
 0x18b   : > { %v422_v34 = vpop.f32.mrf.mxu0  ;;  %v1660_v39 = vpop.f32.mrf.mxu1 }
 0x18c   : > { %v750_v35 = vadd.f32 %v749_v31, %v719_v30  ;;  %1119 = vst [vmem:[%s1625_s18 + $0x28] sm:$0xff] %v1063_v32   ;;  %v1058_v36 = vpack.c.bf16 %v422_v34, %v419_v22  ;;  %v682_v37 = vadd.f32 %v681_v29, %v422_v34  ;;  %v720_v38 = vmul.f32 %v422_v34, %v422_v34 }
 0x18d   : > { %v1172_v40 = vpop.f32.mrf.mxu0  ;;  %v1103_v41 = vpack.c.bf16 %v1660_v39, %v1654_v27  ;;  %v1665_v45 = vpop.f32.mrf.mxu1 }
 0x18e   : > { %1118 = vst [vmem:[%s1625_s18 + $0x20] sm:$0xff] %v1058_v36   ;;  %v683_v43 = vadd.f32 %v1168_v16, %v682_v37  ;;  %v751_v44 = vadd.f32 %v750_v35, %v720_v38  ;;  %v1098_v48 = vpack.c.bf16 %v1665_v45, %v1657_v33  ;;  %v725_v6 = vmul.f32 %v1172_v40, %v1172_v40 }
 0x18f   : > { %v435_v47 = vpop.f32.mrf.mxu0  ;;  %1127 = vst [vmem:[%s1625_s18 + $0x68] sm:$0xff] %v1103_v41   ;;  %v1670_v53 = vpop.f32.mrf.mxu1  ;;  %v727_v16 = vmul.f32 %v1621_v49, %v1621_v49 }
 0x190   : > { %v752_v51 = vadd.f32 %v751_v44, %v721_v42  ;;  %v684_v52 = vadd.f32 %v1169_v28, %v683_v43  ;;  %1126 = vst [vmem:[%s1625_s18 + $0x60] sm:$0xff] %v1098_v48   ;;  %v723_v57 = vmul.f32 %v435_v47, %v435_v47 }
 0x191   : > { %v1173_v54 = vpop.f32.mrf.mxu0  ;;  %v1673_v60 = vpop.f32.mrf.mxu1 }
 0x192   : > { %v685_v56 = vadd.f32 %v684_v52, %v435_v47  ;;  %v753_v58 = vadd.f32 %v752_v51, %v722_v50  ;;  %v1073_v59 = vpack.c.bf16 %v1173_v54, %v1172_v40  ;;  %v726_v12 = vmul.f32 %v1173_v54, %v1173_v54 }
 0x193   : > { %v438_v62 = vpop.f32.mrf.mxu0  ;;  %v1678_v4 = vpop.f32.mrf.mxu1 }
 0x194   : > { %v754_v63 = vadd.f32 %v753_v58, %v723_v57  ;;  %1121 = vst [vmem:[%s1625_s18 + $0x38] sm:$0xff] %v1073_v59   ;;  %v1068_v0 = vpack.c.bf16 %v438_v62, %v435_v47  ;;  %v686_v1 = vadd.f32 %v685_v56, %v438_v62  ;;  %v724_v2 = vmul.f32 %v438_v62, %v438_v62 }
 0x195   : > { %v1113_v5 = vpack.c.bf16 %v1678_v4, %v1670_v53  ;;  %v1683_v10 = vpop.f32.mrf.mxu1 }
 0x196   : > { %1120 = vst [vmem:[%s1625_s18 + $0x30] sm:$0xff] %v1068_v0   ;;  %v687_v7 = vadd.f32 %v1172_v40, %v686_v1  ;;  %v755_v8 = vadd.f32 %v754_v63, %v724_v2  ;;  %v1108_v11 = vpack.c.bf16 %v1683_v10, %v1673_v60 }
 0x197   : > { %1129 = vst [vmem:[%s1625_s18 + $0x78] sm:$0xff] %v1113_v5  }
 0x198   : > { %v688_v13 = vadd.f32 %v1173_v54, %v687_v7  ;;  %v756_v14 = vadd.f32 %v755_v8, %v725_v6  ;;  %1128 = vst [vmem:[%s1625_s18 + $0x70] sm:$0xff] %v1108_v11  }
 0x19a   : > { %v757_v17 = vadd.f32 %v756_v14, %v726_v12  ;;  %v689_v18 = vadd.f32 %v688_v13, %v1621_v49 }
 0x19b   : > { %1338 = shalt.err (!%p1335_p0)
}
 0x19c   : > { %s1339_s10 = scalar_lea.hbm %s1688_s25, 2048  ;;  %s1343_s27 = scalar_lea.hbm %s1811_s2, 4096 }
 0x19d   : > { %p1340_p5 = scmp.ne.s32.totalorder %s1688_s25, %s1339_s10  ;;  %p1344_p4 = scmp.lt.s32.totalorder %s1688_s25, %s1811_s2 }
 0x19e   : > { %p1345_p6 = scmp.lt.s32.totalorder %s1343_s27, %s1339_s10 }
 0x19f   : > { %p1341_p9 = pnand %p1340_p5, %p1828_p11 }
 0x1a0   : > { %p1346_p8 = por %p1345_p6, %p1344_p4 }
 0x1a1   : > { %p1342_p1 = pneg %p1341_p9 }
 0x1a3   : > { %p1347_p3 = pnand %p1346_p8, %p1342_p1 }
 0x1a5   : > { %1350 = shalt.err (!%p1347_p3)
}
 0x1a6   : > { %s1432_s18 = smov 64   ;;  %s1433_s20 = smov 4   ;;  %v690_v49 = vadd.f32 %v689_v18, %v1633_v61  ;;  %v728_v19 = vmul.f32 %v1633_v61, %v1633_v61  ;;  %v758_v20 = vadd.f32 %v757_v17, %v727_v16  ;;  %v729_v22 = vmul.f32 %v1619_v46, %v1619_v46 }
 0x1a7   : > { %1204 = dma.vmem_to_hbm [thread:$0]  (%p1828_p11), %s1690_s17, 2048, %s1688_s25, %s784_s30, %s1432_s18, %s1432_s18, %s1433_s20   ;;  %v730_v25 = vmul.f32 %v1628_v55, %v1628_v55  ;;  %v731_v30 = vmul.f32 %v1641_v9, %v1641_v9  ;;  %v732_v34 = vmul.f32 %v1649_v21, %v1649_v21  ;;  %v735_v40 = vmul.f32 %v1657_v33, %v1657_v33 }
 0x1a8   : > { %v691_v23 = vadd.f32 %v1619_v46, %v690_v49  ;;  %v759_v24 = vadd.f32 %v758_v20, %v728_v19  ;;  %v733_v46 = vmul.f32 %v1638_v3, %v1638_v3  ;;  %v736_v43 = vmul.f32 %v1665_v45, %v1665_v45  ;;  %s941_s17 = sshll.u32 %s1571_s26, 1  ;;  %s998_s22 = sshll.u32 %s1476_s16, 5 }
 0x1a9   : > { %v739_v51 = vmul.f32 %v1673_v60, %v1673_v60  ;;  %v741_v56 = vmul.f32 %v1670_v53, %v1670_v53  ;;  %s214_s23 = scalar_lea.vmem [#allocation8], %s941_s17  ;;  %vm780_vm1 = vcmask 1040384   ;;  %s1772_s7 = scalar_lea.hbm %s1812_s3, %s998_s22 }
 0x1aa   : > { %v760_v26 = vadd.f32 %v759_v24, %v729_v22  ;;  %v692_v28 = vadd.f32 %v1628_v55, %v691_v23  ;;  %v734_v55 = vmul.f32 %v1644_v15, %v1644_v15  ;;  %s818_s25 = sshll.u32 %s214_s23, 4  ;;  %s789_s8 = scalar_lea.sflag [#allocation9], %s1571_s26  ;;  %s819_s25 = int_to_ptr.vmem [resolvable:$true] %s818_s25 }
 0x1ab   : > { %s1351_s9 = scalar_lea.vmem %s819_s25, 32  ;;  %s1434_s16 = smov [#allocation8]  }
 0x1ac   : > { %v693_v29 = vadd.f32 %v692_v28, %v1641_v9  ;;  %v761_v31 = vadd.f32 %v760_v26, %v730_v25  ;;  %p1352_p7 = scmp.ne.s32.totalorder %s819_s25, %s1351_s9  ;;  %s1355_s10 = sshll.u32 %s1434_s16, 4  ;;  %s1356_s10 = int_to_ptr.vmem [resolvable:$false] %s1355_s10 }
 0x1ad   : > { %s1357_s11 = scalar_lea.vmem %s1356_s10, 64  ;;  %p1358_p2 = scmp.lt.s32.totalorder %s819_s25, %s1356_s10 }
 0x1ae   : > { %v762_v61 = vadd.f32 %v761_v31, %v731_v30  ;;  %v694_v32 = vadd.f32 %v693_v29, %v1649_v21  ;;  %p1353_p12 = pnand %p1352_p7, %p1828_p11  ;;  %p1359_p13 = scmp.lt.s32.totalorder %s1357_s11, %s1351_s9 }
 0x1b0   : > { %v695_v35 = vadd.f32 %v1638_v3, %v694_v32  ;;  %v763_v36 = vadd.f32 %v762_v61, %v732_v34  ;;  %v737_v3 = vmul.f32 %v1654_v27, %v1654_v27  ;;  %p1354_p10 = pneg %p1353_p12  ;;  %p1360_p0 = por %p1359_p13, %p1358_p2 }
 0x1b2   : > { %v764_v37 = vadd.f32 %v763_v36, %v733_v46  ;;  %v696_v38 = vadd.f32 %v1644_v15, %v695_v35  ;;  %v738_v15 = vmul.f32 %v1660_v39, %v1660_v39  ;;  %p1361_p5 = pnand %p1360_p0, %p1354_p10 }
 0x1b4   : > { %v697_v9 = vadd.f32 %v696_v38, %v1657_v33  ;;  %v765_v41 = vadd.f32 %v764_v37, %v734_v55 }
 0x1b6   : > { %v766_v42 = vadd.f32 %v765_v41, %v735_v40  ;;  %v698_v21 = vadd.f32 %v697_v9, %v1665_v45 }
 0x1b8   : > { %v699_v44 = vadd.f32 %v1654_v27, %v698_v21  ;;  %v767_v47 = vadd.f32 %v766_v42, %v736_v43  ;;  %v740_v27 = vmul.f32 %v1683_v10, %v1683_v10 }
 0x1ba   : > { %v768_v48 = vadd.f32 %v767_v47, %v737_v3  ;;  %v700_v50 = vadd.f32 %v1660_v39, %v699_v44  ;;  %v742_v39 = vmul.f32 %v1678_v4, %v1678_v4 }
 0x1bc   : > { %v701_v33 = vadd.f32 %v700_v50, %v1673_v60  ;;  %v769_v52 = vadd.f32 %v768_v48, %v738_v15 }
 0x1be   : > { %v770_v45 = vadd.f32 %v769_v52, %v739_v51  ;;  %v702_v54 = vadd.f32 %v701_v33, %v1683_v10 }
 0x1c0   : > { %v703_v57 = vadd.f32 %v1670_v53, %v702_v54  ;;  %v771_v58 = vadd.f32 %v770_v45, %v740_v27 }
 0x1c2   : > { %v704_v59 = vadd.f32 %v1678_v4, %v703_v57  ;;  %v772_v60 = vadd.f32 %v771_v58, %v741_v56 }
 0x1c4   : > { %v705_v62 = vrot.slane %v704_v59, 4  ;;  %v773_v63 = vadd.f32 %v772_v60, %v742_v39 }
 0x1c6   : > { %v706_v0 = vadd.f32 %v705_v62, %v704_v59  ;;  %v774_v1 = vrot.slane %v773_v63, 4 }
 0x1c8   : > { %v707_v2 = vrot.slane %v706_v0, 2  ;;  %v775_v5 = vadd.f32 %v774_v1, %v773_v63 }
 0x1ca   : > { %v708_v6 = vadd.f32 %v707_v2, %v706_v0  ;;  %v776_v7 = vrot.slane %v775_v5, 2 }
 0x1cc   : > { %v709_v8 = vrot.slane %v708_v6, 1  ;;  %v777_v53 = vadd.f32 %v776_v7, %v775_v5 }
 0x1ce   : > { %v778_v10 = vrot.slane %v777_v53, 1  ;;  %v710_v4 = vadd.f32 %v709_v8, %v708_v6 }
 0x1d0   : > { %v779_v11 = vadd.f32 %v778_v10, %v777_v53 }
 0x1d2   : > { %v781_v12 = vsel %vm780_vm1, %v710_v4, %v779_v11 }
 0x1d3   : > { %782 = vst [vmem:[%s214_s23] sm:$0x3] %v781_v12 }
 0x1d4   : > { %1364 = shalt.err (!%p1361_p5)
}
 0x1d5   : > { %s1365_s21 = scalar_lea.hbm %s1772_s7, 32  ;;  %s1369_s28 = scalar_lea.hbm %s1812_s3, 64 }
 0x1d6   : > { %p1366_p9 = scmp.ne.s32.totalorder %s1772_s7, %s1365_s21  ;;  %p1370_p6 = scmp.lt.s32.totalorder %s1772_s7, %s1812_s3 }
 0x1d7   : > { %p1371_p8 = scmp.lt.s32.totalorder %s1369_s28, %s1365_s21 }
 0x1d8   : > { %p1367_p1 = pnand %p1366_p9, %p1828_p11 }
 0x1d9   : > { %p1372_p3 = por %p1371_p8, %p1370_p6 }
 0x1da   : > { %p1368_p4 = pneg %p1367_p1 }
 0x1dc   : > { %p1373_p7 = pnand %p1372_p3, %p1368_p4 }
 0x1de   : > { %1376 = shalt.err (!%p1373_p7)
}
 0x1df   : > { %1205 = dma.vmem_to_hbm [thread:$0]  (%p1828_p11), %s819_s25, 32, %s1772_s7, %s789_s8  }
 0x1e0 PF: > { %s830_s20 = sand.u32 1, %s1411_s12   ;;  %p1829_p12 = scmp.ne.s32.totalorder %s1818_s19, 0 }
 0x1e1   : > { %p1830_p10 = scmp.ge.s32.totalorder %s1423_s15, 2  ;;  %s831_s17 = scalar_lea.sflag [#allocation4], %s830_s20 }
 0x1e3   : > { %p1217_p2 = pnand %p1830_p10, %p1829_p12 }
 0x1e5   : > { %p1218_p13 = pneg %p1217_p2 }
 0x1e7   : > { %1402 = dma.done.wait (%p1218_p13), %s831_s17, 2048  }
 0x1e8   : > { %1404 = vsyncadd (%p1218_p13), %s831_s17, 4294965248  ;;  %s840_s22 = scalar_lea.sflag [#allocation9], %s830_s20 }
 0x1e9   : > { %1406 = dma.done.wait (%p1218_p13), %s840_s22, 32  }
 0x1ea   : > { %1408 = vsyncadd (%p1218_p13), %s840_s22, 4294967264  ;;  %p21_p11 = scmp.ge.s32.totalorder %s1509_s24, 4   ;;  %s1831_s12 = smov %s1415_s13 }
 0x1eb   : > { %s1832_s13 = smov %s1419_s14  ;;  %s1833_s14 = smov %s1526_s5 }
 0x1ec   : > { %s1834_s15 = smov %s1509_s24  ;;  %23 = sbr.rel (!%p21_p11) target bundleno = 8 (0x8), region = 94 }
 0x1f1   :  { %845 = vsyncpa [#allocation3], 1 }
 0x1f2   :  { %847 = vsyncpa [#allocation3 + $0x1], 1 }
 0x1f3   :  { %848 = vsyncpa [#allocation6], 1 }
 0x1f4   :  { %849 = vsyncpa [#allocation4], 1 }
 0x1f5   :  { %851 = vsyncpa [#allocation4 + $0x1], 1 }
 0x1f6   :  { %852 = vsyncpa [#allocation9], 1 }
 0x1f7   :  { %854 = vsyncpa [#allocation9 + $0x1], 1 }

</bundles_post_ra>
